<compile_context>
chip_gen: v5e
topology: v5e:2x2
jax: 0.10.0
libtpu: 0.0.40
codegen_flags: <defaults>
</compile_context>

<pallas_src>
import functools

import jax
import jax.numpy as jnp
from jax import lax
from jax.experimental import pallas as pl
from jax.experimental.pallas import tpu as pltpu


def _attention_kernel(x_ref, wk_ref, bk_ref, wv_ref, bv_ref,
                      wproj_ref, bproj_ref, vhist_ref, out_ref):
    x = x_ref[...]                                                   # [B, inp_d]

    # ---- k / v projections (MXU); torch-layout weights via trans-B dots ----
    k = lax.dot_general(
        x, wk_ref[...],
        dimension_numbers=(((1,), (1,)), ((), ())),
        preferred_element_type=jnp.float32) + bk_ref[...]            # [B, hid_d]
    v = lax.dot_general(
        x, wv_ref[...],
        dimension_numbers=(((1,), (1,)), ((), ())),
        preferred_element_type=jnp.float32) + bv_ref[...]            # [B, hid_d]

    # ---- "attention": softmax over a size-1 axis is identically 1.0, so the
    #      head outputs collapse to the sequence sum of V (history + new row) ----
    vraw = jnp.sum(vhist_ref[...], axis=1) + v                       # [B, hid_d]

    # ---- output projection (MXU), bias added in-register ----
    v_next = lax.dot_general(
        vraw, wproj_ref[...],
        dimension_numbers=(((1,), (1,)), ((), ())),
        preferred_element_type=jnp.float32) + bproj_ref[...]         # [B, hid_d]

    # ---- single packed output slab: one writeback DMA, aligned stores ----
    out_ref[0, :, :] = k
    out_ref[1, :, :] = v
    out_ref[2, :, :] = v_next


@functools.partial(jax.jit, static_argnames="n_head")
def attention_forward(x, his_data, W_attn, b_attn, W_proj, b_proj, n_head):
    """Mirror of Attention.forward. his_data = (K_hist, V_hist), each [B, T, hid_d]."""
    if his_data is None:
        # TODO(synk): his_data=None branch of the torch forward is unsupported.
        raise NotImplementedError("his_data=None is not supported")

    hid_d = W_proj.shape[0]
    B, inp_d = x.shape
    K_hist, V_hist = his_data
    T = K_hist.shape[1]
    S = T + 1
    dh = hid_d // n_head

    # Drop the dead W_q third of the QKV projection; give k and v their own
    # weight slabs so both land at lane offset 0 inside the kernel.
    W_k = W_attn[hid_d:2 * hid_d]
    W_v = W_attn[2 * hid_d:3 * hid_d]
    b_k = b_attn[hid_d:2 * hid_d].reshape(1, -1)       # free contiguous views
    b_v = b_attn[2 * hid_d:3 * hid_d].reshape(1, -1)

    vspec = pl.BlockSpec(memory_space=pltpu.MemorySpace.VMEM)

    # Advisory cost estimate (bytes reflect that K_hist is no longer touched
    # and the cache is no longer rewritten inside the kernel).
    flops = 2 * B * inp_d * 2 * hid_d + 2 * B * hid_d * hid_d
    bytes_accessed = 4 * (x.size + W_k.size + W_v.size + b_k.size + b_v.size
                          + W_proj.size + b_proj.size + V_hist.size
                          + 3 * B * hid_d)

    # NOTE: all arrays are tiny, so no grid / tiling.  If B, T or hid_d scale
    # up, add a gridded BlockSpec over B marked "parallel" (shards over v7x's
    # 2 TensorCores), size tiles against 64 MiB VMEM on v7x vs 128 MiB on
    # v5e/v6e, and raise vmem_limit_bytes via pltpu.CompilerParams.
    packed = pl.pallas_call(
        _attention_kernel,
        out_shape=jax.ShapeDtypeStruct((3, B, hid_d), jnp.float32),
        in_specs=[vspec] * 8,
        out_specs=vspec,
        cost_estimate=pl.CostEstimate(flops=flops, transcendentals=0,
                                      bytes_accessed=bytes_accessed),
    )(x,
      W_k, b_k,                 # [hid_d, inp_d], [1, hid_d]  (torch layout)
      W_v, b_v,                 # [hid_d, inp_d], [1, hid_d]
      W_proj,                   # [hid_d, hid_d]              (torch layout)
      b_proj.reshape(1, -1),
      V_hist)

    k, v, v_next = packed[0], packed[1], packed[2]

    # Glue (XLA, fused under jit): K/V concat + the module's head-major
    # reshape/transpose in one pass — K_hist/V_hist never round-trip VMEM.
    def _cat_head_major(hist, row):
        cat = jnp.concatenate([hist, row[:, None, :]], axis=1)       # [B, S, hid_d]
        return (cat.reshape(B, S, n_head, dh)
                   .transpose(0, 2, 1, 3)
                   .reshape(B, -1, hid_d))

    return _cat_head_major(K_hist, k), _cat_head_major(V_hist, v), v_next


def reference(x, K_hist, V_hist, W_attn, b_attn, W_proj, b_proj, n_head, hid_d):
    """Pure-JAX transcription of the torch forward for verification."""
    qkv = x @ W_attn.T + b_attn
    q, k, v = qkv[:, :hid_d], qkv[:, hid_d:2 * hid_d], qkv[:, 2 * hid_d:]
    K = jnp.concatenate([K_hist, k[:, None, :]], axis=1)
    V = jnp.concatenate([V_hist, v[:, None, :]], axis=1)
    B = x.shape[0]
    dh = hid_d // n_head
    K4 = K.reshape(B, -1, n_head, dh).transpose(0, 2, 1, 3)
    V4 = V.reshape(B, -1, n_head, dh).transpose(0, 2, 1, 3)
    q4 = q.reshape(B, n_head, dh, 1)
    att = jax.nn.softmax(K4 @ q4, axis=-1)
    v_next = jnp.swapaxes(V4, -1, -2) @ att
    v_next = v_next.reshape(B, -1)
    v_next = v_next @ W_proj.T + b_proj
    return K4.reshape(B, -1, hid_d), V4.reshape(B, -1, hid_d), v_next


if __name__ == "__main__":
    B, inp_d, hid_d, n_head, T = 2, 24, 32, 4, 8

    key = jax.random.PRNGKey(0)
    ks = jax.random.split(key, 7)
    x = jax.random.normal(ks[0], (B, inp_d), jnp.float32)
    K_hist = jax.random.normal(ks[1], (B, T, hid_d), jnp.float32)
    V_hist = jax.random.normal(ks[2], (B, T, hid_d), jnp.float32)
    # Deterministic synthetic parameters (shapes follow nn.Linear in __init__).
    W_attn = jax.random.normal(ks[3], (3 * hid_d, inp_d), jnp.float32) / jnp.sqrt(inp_d)
    b_attn = jax.random.normal(ks[4], (3 * hid_d,), jnp.float32) * 0.01
    W_proj = jax.random.normal(ks[5], (hid_d, hid_d), jnp.float32) / jnp.sqrt(hid_d)
    b_proj = jax.random.normal(ks[6], (hid_d,), jnp.float32) * 0.01

    K_out, V_out, v_next = attention_forward(
        x, (K_hist, V_hist), W_attn, b_attn, W_proj, b_proj, n_head=n_head)
    jax.block_until_ready((K_out, V_out, v_next))

    K_ref, V_ref, v_ref = reference(
        x, K_hist, V_hist, W_attn, b_attn, W_proj, b_proj, n_head, hid_d)

    assert K_out.shape == K_ref.shape and V_out.shape == V_ref.shape and v_next.shape == v_ref.shape
    assert jnp.allclose(K_out, K_ref, atol=1e-4, rtol=1e-4)
    assert jnp.allclose(V_out, V_ref, atol=1e-4, rtol=1e-4)
    assert jnp.allclose(v_next, v_ref, atol=1e-4, rtol=1e-4)

    print("KERNEL_OK")
</pallas_src>

<mosaic_0001>
module attributes {stable_mosaic.version = 11 : i64} {
  func.func @_attention_kernel(%arg0: memref<2x24xf32, #tpu.memory_space<vmem>>, %arg1: memref<32x24xf32, #tpu.memory_space<vmem>>, %arg2: memref<1x32xf32, #tpu.memory_space<vmem>>, %arg3: memref<32x24xf32, #tpu.memory_space<vmem>>, %arg4: memref<1x32xf32, #tpu.memory_space<vmem>>, %arg5: memref<32x32xf32, #tpu.memory_space<vmem>>, %arg6: memref<1x32xf32, #tpu.memory_space<vmem>>, %arg7: memref<2x8x32xf32, #tpu.memory_space<vmem>>, %arg8: memref<3x2x32xf32, #tpu.memory_space<vmem>>) attributes {dimension_semantics = [], scalar_prefetch = 0 : i64, scratch_operands = 0 : i64, tpu.core_type = #tpu.core_type<tc>} {
    %c0 = arith.constant 0 : index
    %c0_0 = arith.constant 0 : index
    %0 = vector.load %arg0[%c0, %c0_0] : memref<2x24xf32, #tpu.memory_space<vmem>>, vector<2x24xf32>
    %c0_1 = arith.constant 0 : index
    %c0_2 = arith.constant 0 : index
    %1 = vector.load %arg1[%c0_1, %c0_2] : memref<32x24xf32, #tpu.memory_space<vmem>>, vector<32x24xf32>
    %cst = arith.constant dense<0.000000e+00> : vector<2x32xf32>
    %2 = tpu.matmul %0, %1, %cst {dimension_numbers = #tpu.dot_dimension_numbers<[1], [1], [0], [0], [0, 0, 1, 0], [], []>} : vector<2x24xf32>, vector<32x24xf32>, vector<2x32xf32> -> vector<2x32xf32>
    %c0_3 = arith.constant 0 : index
    %c0_4 = arith.constant 0 : index
    %3 = vector.load %arg2[%c0_3, %c0_4] : memref<1x32xf32, #tpu.memory_space<vmem>>, vector<1x32xf32>
    %4 = vector.broadcast %3 : vector<1x32xf32> to vector<2x32xf32>
    %5 = arith.addf %2, %4 : vector<2x32xf32>
    %c0_5 = arith.constant 0 : index
    %c0_6 = arith.constant 0 : index
    %6 = vector.load %arg3[%c0_5, %c0_6] : memref<32x24xf32, #tpu.memory_space<vmem>>, vector<32x24xf32>
    %cst_7 = arith.constant dense<0.000000e+00> : vector<2x32xf32>
    %7 = tpu.matmul %0, %6, %cst_7 {dimension_numbers = #tpu.dot_dimension_numbers<[1], [1], [0], [0], [0, 0, 1, 0], [], []>} : vector<2x24xf32>, vector<32x24xf32>, vector<2x32xf32> -> vector<2x32xf32>
    %c0_8 = arith.constant 0 : index
    %c0_9 = arith.constant 0 : index
    %8 = vector.load %arg4[%c0_8, %c0_9] : memref<1x32xf32, #tpu.memory_space<vmem>>, vector<1x32xf32>
    %9 = vector.broadcast %8 : vector<1x32xf32> to vector<2x32xf32>
    %10 = arith.addf %7, %9 : vector<2x32xf32>
    %c0_10 = arith.constant 0 : index
    %c0_11 = arith.constant 0 : index
    %c0_12 = arith.constant 0 : index
    %11 = vector.load %arg7[%c0_10, %c0_11, %c0_12] : memref<2x8x32xf32, #tpu.memory_space<vmem>>, vector<2x8x32xf32>
    %cst_13 = arith.constant dense<0.000000e+00> : vector<2x32xf32>
    %12 = vector.multi_reduction <add>, %11, %cst_13 [1] : vector<2x8x32xf32> to vector<2x32xf32>
    %13 = arith.addf %12, %10 : vector<2x32xf32>
    %c0_14 = arith.constant 0 : index
    %c0_15 = arith.constant 0 : index
    %14 = vector.load %arg5[%c0_14, %c0_15] : memref<32x32xf32, #tpu.memory_space<vmem>>, vector<32x32xf32>
    %cst_16 = arith.constant dense<0.000000e+00> : vector<2x32xf32>
    %15 = tpu.matmul %13, %14, %cst_16 {dimension_numbers = #tpu.dot_dimension_numbers<[1], [1], [0], [0], [0, 0, 1, 0], [], []>} : vector<2x32xf32>, vector<32x32xf32>, vector<2x32xf32> -> vector<2x32xf32>
    %c0_17 = arith.constant 0 : index
    %c0_18 = arith.constant 0 : index
    %16 = vector.load %arg6[%c0_17, %c0_18] : memref<1x32xf32, #tpu.memory_space<vmem>>, vector<1x32xf32>
    %17 = vector.broadcast %16 : vector<1x32xf32> to vector<2x32xf32>
    %18 = arith.addf %15, %17 : vector<2x32xf32>
    %c0_19 = arith.constant 0 : index
    %c0_20 = arith.constant 0 : index
    %c0_21 = arith.constant 0 : index
    %19 = vector.load %arg8[%c0_19, %c0_20, %c0_21] : memref<3x2x32xf32, #tpu.memory_space<vmem>>, vector<1x2x32xf32>
    %20 = vector.shape_cast %19 : vector<1x2x32xf32> to vector<2x32xf32>
    %21 = vector.shape_cast %5 : vector<2x32xf32> to vector<1x2x32xf32>
    tpu.vector_store %arg8[%c0_19, %c0_20, %c0_21], %21 {strides = array<i32>} : memref<3x2x32xf32, #tpu.memory_space<vmem>>, vector<1x2x32xf32>,
    %c1 = arith.constant 1 : index
    %c0_22 = arith.constant 0 : index
    %c0_23 = arith.constant 0 : index
    %22 = vector.load %arg8[%c1, %c0_22, %c0_23] : memref<3x2x32xf32, #tpu.memory_space<vmem>>, vector<1x2x32xf32>
    %23 = vector.shape_cast %22 : vector<1x2x32xf32> to vector<2x32xf32>
    %24 = vector.shape_cast %10 : vector<2x32xf32> to vector<1x2x32xf32>
    tpu.vector_store %arg8[%c1, %c0_22, %c0_23], %24 {strides = array<i32>} : memref<3x2x32xf32, #tpu.memory_space<vmem>>, vector<1x2x32xf32>,
    %c2 = arith.constant 2 : index
    %c0_24 = arith.constant 0 : index
    %c0_25 = arith.constant 0 : index
    %25 = vector.load %arg8[%c2, %c0_24, %c0_25] : memref<3x2x32xf32, #tpu.memory_space<vmem>>, vector<1x2x32xf32>
    %26 = vector.shape_cast %25 : vector<1x2x32xf32> to vector<2x32xf32>
    %27 = vector.shape_cast %18 : vector<2x32xf32> to vector<1x2x32xf32>
    tpu.vector_store %arg8[%c2, %c0_24, %c0_25], %27 {strides = array<i32>} : memref<3x2x32xf32, #tpu.memory_space<vmem>>, vector<1x2x32xf32>,
    return
  }
}

</mosaic_0001>

<bundles_post_ra>
// kernel: attention_forward.1
= control target key start
LH: loop header
LB: loop body
LE: loop exit
PB: predicated region body
PF: predicated region fallthrough
CT: control target
= control target key end

     0   :  { %vm38_vm0 = vcmask 195584   ;;  %vm116_vm1 = vcmask 261120   ;;  %vm184_vm2 = vcmask 254976   ;;  %vm148_vm3 = vcmask 1041409   ;;  %s342_s3 = inlined_call_operand.vmem [shape: f32[32,24], index: 3, kind: input, shape index: {}]   ;;  %s343_s5 = inlined_call_operand.vmem [shape: f32[32,32], index: 5, kind: input, shape index: {}]   ;;  %s344_s4 = inlined_call_operand.vmem [shape: f32[1,32], index: 4, kind: input, shape index: {}]   ;;  %s345_s0 = inlined_call_operand.vmem [shape: f32[2,24], index: 0, kind: input, shape index: {}]   ;;  %s346_s2 = inlined_call_operand.vmem [shape: f32[1,32], index: 2, kind: input, shape index: {}]   ;;  %s347_s1 = inlined_call_operand.vmem [shape: f32[32,24], index: 1, kind: input, shape index: {}]   ;;  %s348_s7 = inlined_call_operand.vmem [shape: f32[2,8,32], index: 7, kind: input, shape index: {}]   ;;  %s349_s6 = inlined_call_operand.vmem [shape: f32[1,32], index: 6, kind: input, shape index: {}]   ;;  %s350_s8 = inlined_call_operand.vmem [shape: f32[3,2,32], index: 8, kind: output, shape index: {}]  }
   0x1   :  { %v77_v0 = vld [vmem:[%s342_s3 + $0x18] sm:$0xff]  ;;  %v76_v2 = vld [vmem:[%s342_s3 + $0x10] sm:$0xff]  ;;  %v75_v4 = vld [vmem:[%s342_s3 + $0x8] sm:$0xff] }
   0x2   :  { %199 = vmatpush.xpose.msk.msra.mxu1 %vm38_vm0, %v77_v0  ;;  %v140_v1 = vld [vmem:[%s343_s5 + $0x18] sm:$0xff]  ;;  %v139_v3 = vld [vmem:[%s343_s5 + $0x10] sm:$0xff]  ;;  %v74_v5 = vld [vmem:[%s342_s3] sm:$0xff] }
   0x3   :  { %204 = vmatpush.xpose.msk.msra.mxu2 %vm116_vm1, %v140_v1  ;;  %v29_v6 = vld [vmem:[%s345_s0] sm:$0x3]  ;;  %v33_v7 = vld [vmem:[%s347_s1 + $0x18] sm:$0xff]  ;;  %v138_v8 = vld [vmem:[%s343_s5 + $0x8] sm:$0xff] }
   0x4   :  { %194 = vmatpush.xpose.msk.msra.mxu0 %vm38_vm0, %v33_v7  ;;  %v32_v9 = vld [vmem:[%s347_s1 + $0x10] sm:$0xff]  ;;  %v137_v10 = vld [vmem:[%s343_s5] sm:$0xff]  ;;  %v31_v11 = vld [vmem:[%s347_s1 + $0x8] sm:$0xff] }
   0x5   :  { %v115_v12 = vld [vmem:[%s348_s7 + $0x8] sm:$0xff]  ;;  %v114_v13 = vld [vmem:[%s348_s7] sm:$0xff] }
   0x6   :  { %200 = vmatpush.xpose.msk.msra.mxu1 %vm38_vm0, %v76_v2  ;;  %v124_v14 = vsel %vm116_vm1, %v115_v12, 0.0  ;;  %v30_v15 = vld [vmem:[%s347_s1] sm:$0xff]  ;;  %v117_v16 = vsel %vm116_vm1, %v114_v13, 0.0 }
   0x7   :  { %205 = vmatpush.xpose.msk.msra.mxu2 %vm116_vm1, %v139_v3  ;;  %v125_v17 = vrot.slane %v124_v14, 4  ;;  %v118_v18 = vrot.slane %v117_v16, 4  ;;  %v211_v25 = vld [vmem:[%s344_s4] ss:$0 sm:$0xff] }
   0x8   :  { %195 = vmatpush.xpose.msk.msra.mxu0 %vm38_vm0, %v32_v9  ;;  %v212_v37 = vld [vmem:[%s346_s2] ss:$0 sm:$0xff] }
   0x9   :  { %v126_v19 = vadd.f32 %v125_v17, %v124_v14  ;;  %v119_v20 = vadd.f32 %v118_v18, %v117_v16  ;;  %v213_v40 = vld [vmem:[%s349_s6] ss:$0 sm:$0xff] }
   0xa   :  { %201 = vmatpush.xpose.msk.msra.mxu1 %vm38_vm0, %v75_v4 }
   0xb   :  { %206 = vmatpush.xpose.msk.msra.mxu2 %vm116_vm1, %v138_v8  ;;  %v127_v21 = vrot.slane %v126_v19, 2  ;;  %v120_v22 = vrot.slane %v119_v20, 2 }
   0xc   :  { %196 = vmatpush.xpose.msk.msra.mxu0 %vm38_vm0, %v31_v11 }
   0xd   :  { %v128_v23 = vadd.f32 %v127_v21, %v126_v19  ;;  %v121_v24 = vadd.f32 %v120_v22, %v119_v20 }
   0xe   :  { %202 = vmatpush.xpose.msk.msra.mxu1 %vm38_vm0, %v74_v5 }
   0xf   :  { %207 = vmatpush.xpose.msk.msra.mxu2 %vm116_vm1, %v137_v10  ;;  %v129_v26 = vrot.slane %v128_v23, 1  ;;  %v122_v27 = vrot.slane %v121_v24, 1 }
  0x10   :  { %197 = vmatpush.xpose.msk.msra.mxu0 %vm38_vm0, %v30_v15 }
  0x11   :  { %203 = vmatmul.msk.f32.vlgmr.msra.gmra.mxu1 %vm38_vm0, %v29_v6  ;;  %v130_v30 = vadd.f32 %v129_v26, %v128_v23  ;;  %v123_v31 = vadd.f32 %v122_v27, %v121_v24 }
  0x13   :  { %198 = vmatmul.msk.f32.vlgmr.msra.gmra.mxu0 %vm38_vm0, %v29_v6 }
  0x8e   :  { %v111_v28 = vpop.f32.mrf.mxu1 }
  0x8f   :  { %v112_v29 = vadd.f32 %v211_v25, %v111_v28 }
  0x90   :  { %v71_v38 = vpop.f32.mrf.mxu0 }
  0x91   :  { %v132_v32 = vrot.slane %v112_v29, 1  ;;  %209 = vst.msk [vmem:[%s350_s8 + $0x2] sm:$0x3] %vm184_vm2, %v112_v29  ;;  %v135_v34 = vadd.f32 %v123_v31, %v112_v29  ;;  %v72_v39 = vadd.f32 %v212_v37, %v71_v38 }
  0x93   :  { %v136_v33 = vadd.f32 %v132_v32, %v130_v30  ;;  %185 = vst.msk [vmem:[%s350_s8] sm:$0x3] %vm184_vm2, %v72_v39 }
  0x95   :  { %v147_v35 = vrot.slane %v136_v33, 7 }
  0x97   :  { %v149_v36 = vsel %vm148_vm3, %v147_v35, %v135_v34 }
  0x98   :  { %208 = vmatmul.msk.f32.vlgmr.msra.gmra.mxu2 %vm116_vm1, %v149_v36 }
 0x11b   :  { %v181_v41 = vpop.f32.mrf.mxu2 }
 0x11c   :  { %v182_v42 = vadd.f32 %v213_v40, %v181_v41 }
 0x11e   :  { %210 = vst.msk [vmem:[%s350_s8 + $0x4] sm:$0x3] %vm184_vm2, %v182_v42 }

</bundles_post_ra>
